<compile_context>
chip_gen: v7x
topology: tpu7x:2x2x1
jax: 0.10.0
libtpu: 0.0.40
codegen_flags: <defaults>
</compile_context>

<pallas_src>
import jax
import jax.numpy as jnp
from jax.experimental import pallas as pl
from jax.experimental.pallas import tpu as pltpu


def _round_up(x: int, m: int) -> int:
    return ((x + m - 1) // m) * m


def _fused_linear_kernel(x_ref, w_ref, b_ref, o_ref):
    # x_ref: (M, D) bf16, w_ref: (D, TN) bf16, b_ref: (1, TN) f32, o_ref: (M, TN) f32
    acc = jnp.dot(x_ref[...], w_ref[...], preferred_element_type=jnp.float32)
    o_ref[...] = acc + b_ref[...]


def fused_linear(x, w, b, tile_n):
    """y = x @ w + b, x:(M,D), w:(D,N), b:(1,N) -> (M,N) f32, tiled over N."""
    M, D = x.shape
    Dw, N = w.shape
    assert Dw == D
    assert N % tile_n == 0 and tile_n % 128 == 0
    grid = (N // tile_n,)
    return pl.pallas_call(
        _fused_linear_kernel,
        out_shape=jax.ShapeDtypeStruct((M, N), jnp.float32),
        grid=grid,
        in_specs=[
            pl.BlockSpec((M, D), lambda j: (0, 0)),        # embedding rows (resident)
            pl.BlockSpec((D, tile_n), lambda j: (0, j)),   # streamed, double-buffered
            pl.BlockSpec((1, tile_n), lambda j: (0, j)),   # fused bias tile
        ],
        out_specs=pl.BlockSpec((M, tile_n), lambda j: (0, j)),
        compiler_params=pltpu.CompilerParams(
            dimension_semantics=("parallel",),  # independent N tiles -> megacore on v7x
        ),
    )(x, w, b)


class AdapterHyperNetPallas:
    """JAX/Pallas port of hyperformer's AdapterHyperNet (fused generators)."""

    def __init__(self, task_embedding_dim, input_dim, output_dim, key,
                 tile_n=512, param_dtype=jnp.bfloat16):
        self.input_dim = input_dim
        self.output_dim = output_dim
        self.param_dtype = param_dtype

        n_true = input_dim * output_dim + input_dim  # weight cols + bias cols
        self.n_true = n_true
        # Tile width: multiple of 128, capped at 512 (well under v7x VMEM with
        # double buffering); pad fused N up to a multiple of the tile.
        self.tile_n = min(tile_n, _round_up(n_true, 128))
        self.n_pad = _round_up(n_true, self.tile_n)

        k1, k2 = jax.random.split(key)
        std = 1e-2  # linear_layer init: normal(std=1e-2), bias = 0
        # nn.Linear weights stored transposed, i.e. (D, N), so the forward is a
        # plain row-vector matmul on the MXU.
        w_gen = jax.random.normal(
            k1, (task_embedding_dim, input_dim * output_dim), dtype=jnp.float32) * std
        b_gen = jax.random.normal(
            k2, (task_embedding_dim, input_dim), dtype=jnp.float32) * std
        fused = jnp.concatenate([w_gen, b_gen], axis=1)                # (D, n_true)
        fused = jnp.pad(fused, ((0, 0), (0, self.n_pad - n_true)))     # (D, n_pad)
        self.fused_w = fused.astype(param_dtype)
        # Linear biases are zero-initialized; keep them in f32 for the add.
        self.fused_b = jnp.zeros((1, self.n_pad), dtype=jnp.float32)

    def __call__(self, task_embedding):
        # task_embedding: (D,) or anything reshapeable to (1, D)
        x = task_embedding.reshape(1, -1).astype(self.param_dtype)
        y = fused_linear(x, self.fused_w, self.fused_b, self.tile_n)   # (1, n_pad) f32
        nw = self.input_dim * self.output_dim
        weight = y[0, :nw].reshape(self.input_dim, self.output_dim)
        bias = y[0, nw:nw + self.input_dim]
        return weight, bias


if __name__ == "__main__":
    key = jax.random.PRNGKey(0)
    k_param, k_emb = jax.random.split(key)

    projected_task_embedding_dim = 32
    input_dim = 8
    output_dim = 16

    net = AdapterHyperNetPallas(
        projected_task_embedding_dim, input_dim, output_dim, k_param
    )
    embeddings = jax.random.normal(
        k_emb, (projected_task_embedding_dim,), dtype=jnp.float32
    )

    weight, bias = net(embeddings)
    jax.block_until_ready(weight)
    jax.block_until_ready(bias)

    # Reference check in plain JAX using the same bf16 operands / f32 accumulate.
    x_ref = embeddings.reshape(1, -1).astype(net.param_dtype)
    y_ref = jnp.dot(x_ref, net.fused_w, preferred_element_type=jnp.float32) + net.fused_b
    nw = input_dim * output_dim
    ref_w = y_ref[0, :nw].reshape(input_dim, output_dim)
    ref_b = y_ref[0, nw:nw + input_dim]

    assert weight.shape == (input_dim, output_dim)
    assert bias.shape == (input_dim,)
    assert jnp.allclose(weight, ref_w, atol=1e-4, rtol=1e-4)
    assert jnp.allclose(bias, ref_b, atol=1e-4, rtol=1e-4)

    print("KERNEL_OK")
</pallas_src>

<mosaic_0001>
module attributes {stable_mosaic.version = 11 : i64} {
  func.func @_fused_linear_kernel(%arg0: i32, %arg1: memref<1x32xbf16, #tpu.memory_space<vmem>>, %arg2: memref<32x256xbf16, #tpu.memory_space<vmem>>, %arg3: memref<1x256xf32, #tpu.memory_space<vmem>>, %arg4: memref<1x256xf32, #tpu.memory_space<vmem>>) attributes {dimension_semantics = [#tpu.dimension_semantics<parallel>], iteration_bounds = array<i64: 1>, scalar_prefetch = 0 : i64, scratch_operands = 0 : i64, tpu.core_type = #tpu.core_type<tc>, window_params = [{pipeline_mode = #tpu.pipeline_mode<synchronous>, transform_indices = @transform_0, window_bounds = array<i64: 1, 32>}, {transform_indices = @transform_1, window_bounds = array<i64: 32, 256>}, {transform_indices = @transform_2, window_bounds = array<i64: 1, 256>}, {transform_indices = @transform_3, window_bounds = array<i64: 1, 256>}]} {
    %c0 = arith.constant 0 : index
    %c0_0 = arith.constant 0 : index
    %0 = vector.load %arg1[%c0, %c0_0] : memref<1x32xbf16, #tpu.memory_space<vmem>>, vector<1x32xbf16>
    %c0_1 = arith.constant 0 : index
    %c0_2 = arith.constant 0 : index
    %1 = vector.load %arg2[%c0_1, %c0_2] : memref<32x256xbf16, #tpu.memory_space<vmem>>, vector<32x256xbf16>
    %cst = arith.constant dense<0.000000e+00> : vector<1x256xf32>
    %2 = tpu.matmul %0, %1, %cst {dimension_numbers = #tpu.dot_dimension_numbers<[1], [0], [0], [1], [0, 0, 1, 1], [], []>} : vector<1x32xbf16>, vector<32x256xbf16>, vector<1x256xf32> -> vector<1x256xf32>
    %c0_3 = arith.constant 0 : index
    %c0_4 = arith.constant 0 : index
    %3 = vector.load %arg3[%c0_3, %c0_4] : memref<1x256xf32, #tpu.memory_space<vmem>>, vector<1x256xf32>
    %4 = arith.addf %2, %3 : vector<1x256xf32>
    %c0_5 = arith.constant 0 : index
    %c0_6 = arith.constant 0 : index
    %5 = vector.load %arg4[%c0_5, %c0_6] : memref<1x256xf32, #tpu.memory_space<vmem>>, vector<1x256xf32>
    tpu.vector_store %arg4[%c0_5, %c0_6], %4 {strides = array<i32>} : memref<1x256xf32, #tpu.memory_space<vmem>>, vector<1x256xf32>,
    return
  }
  func.func @transform_0(%arg0: i32) -> (i32, i32) {
    %c0_i32 = arith.constant 0 : i32
    %c0_i32_0 = arith.constant 0 : i32
    %c0_i32_1 = arith.constant 0 : i32
    return %c0_i32, %c0_i32_0 : i32, i32
  }
  func.func @transform_1(%arg0: i32) -> (i32, i32) {
    %c0_i32 = arith.constant 0 : i32
    %c0_i32_0 = arith.constant 0 : i32
    return %c0_i32, %arg0 : i32, i32
  }
  func.func @transform_2(%arg0: i32) -> (i32, i32) {
    %c0_i32 = arith.constant 0 : i32
    %c0_i32_0 = arith.constant 0 : i32
    return %c0_i32, %arg0 : i32, i32
  }
  func.func @transform_3(%arg0: i32) -> (i32, i32) {
    %c0_i32 = arith.constant 0 : i32
    %c0_i32_0 = arith.constant 0 : i32
    return %c0_i32, %arg0 : i32, i32
  }
}

</mosaic_0001>

<bundles_post_ra>
// kernel: tpu_custom_call.1
= control target key start
LH: loop header
LB: loop body
LE: loop exit
PB: predicated region body
PF: predicated region fallthrough
CT: control target
= control target key end

     0   :  { %8 = vsyncpa [#allocation3], 0  ;;  %s326_s0 = inlined_call_operand.hbm [shape: bf16[1,32], index: 0, kind: input, shape index: {}]   ;;  %s327_s1 = inlined_call_operand.hbm [shape: bf16[32,256], index: 1, kind: input, shape index: {}]   ;;  %s328_s2 = inlined_call_operand.vmem [shape: f32[1,256], index: 2, kind: input, shape index: {}]   ;;  %s329_s3 = inlined_call_operand.hbm [shape: f32[1,256], index: 3, kind: output, shape index: {}]  }
   0x1   :  { %9 = vsyncpa [#allocation6], 0 }
   0x2   :  { %10 = vsyncpa [#allocation4], 0  ;;  %s253_s12 = smov [#allocation2]   ;;  %s254_s14 = smov [#allocation5]  }
   0x3   :  { %s17_s13 = sshll.u32 %s253_s12, 4  ;;  %s26_s15 = sshll.u32 %s254_s14, 4  ;;  %s18_s13 = int_to_ptr.vmem [resolvable:$true] %s17_s13  ;;  %s280_s15 = int_to_ptr.vmem [resolvable:$true] %s26_s15 }
   0x4   :  { %s181_s18 = scalar_lea.hbm %s326_s0, 16 }
   0x5   :  { %p182_p0 = scmp.ne.s32.totalorder %s326_s0, %s181_s18  ;;  %p185_p1 = scmp.lt.u32.totalorder %s181_s18, %s326_s0 }
   0x7   :  { %p187_p2 = pnand %p185_p1, %p182_p0 }
   0x9   :  { %190 = shalt.err (!%p187_p2)
}
   0xa   :  { %s191_s23 = scalar_lea.vmem %s18_s13, 16  ;;  %s195_s24 = scalar_lea.vmem %s18_s13, 32 }
   0xb   :  { %p192_p3 = scmp.ne.s32.totalorder %s18_s13, %s191_s23  ;;  %p196_p4 = scmp.lt.s32.totalorder %s18_s13, %s18_s13 }
   0xc   :  { %p197_p5 = scmp.lt.s32.totalorder %s195_s24, %s191_s23 }
   0xe   :  { %p198_p6 = por %p197_p5, %p196_p4 }
  0x10   :  { %p199_p7 = pnand %p198_p6, %p192_p3 }
  0x12   :  { %202 = shalt.err (!%p199_p7)
}
  0x13   :  { %20 = dma.hbm_to_vmem [thread:$0]  %s326_s0, 16, %s18_s13, [#allocation3]  }
  0x14   :  { %s203_s29 = scalar_lea.hbm %s327_s1, 512 }
  0x15   :  { %p204_p8 = scmp.ne.s32.totalorder %s327_s1, %s203_s29  ;;  %p207_p9 = scmp.lt.u32.totalorder %s203_s29, %s327_s1 }
  0x17   :  { %p209_p10 = pnand %p207_p9, %p204_p8 }
  0x19   :  { %212 = shalt.err (!%p209_p10)
}
  0x1a   :  { %s213_s7 = scalar_lea.vmem %s280_s15, 512  ;;  %p218_p12 = scmp.lt.s32.totalorder %s280_s15, %s280_s15 }
  0x1b   :  { %p214_p11 = scmp.ne.s32.totalorder %s280_s15, %s213_s7  ;;  %p219_p13 = scmp.lt.s32.totalorder %s213_s7, %s213_s7 }
  0x1d   :  { %p220_p0 = por %p219_p13, %p218_p12 }
  0x1f   :  { %p221_p1 = pnand %p220_p0, %p214_p11 }
  0x21   :  { %224 = shalt.err (!%p221_p1)
}
  0x22   :  { %s255_s0 = smov 128   ;;  %s256_s8 = smov 8  }
  0x23   :  { %32 = dma.hbm_to_vmem [thread:$0]  %s327_s1, 512, %s280_s15, [#allocation6], %s255_s0, %s255_s0, %s256_s8  }
  0x24   :  { %247 = dma.done.wait [#allocation3], 16  }
  0x25   :  { %248 = vsyncadd [#allocation3], 4294967280 }
  0x26   :  { %249 = dma.done.wait [#allocation6], 512  }
  0x27   :  { %250 = vsyncadd [#allocation6], 4294966784  ;;  %v257_v0 = vmov 0   ;;  %v175_v1 = vld [vmem:[#allocation5 + $0x4] ss:$8 sps:$4 sm:$0xff]   ;;  %vm79_vm0 = vcmask 261120   ;;  %v69_v6 = vlaneseq }
  0x28   :  { %115 = vmatprep.mubr.bf16.mxu0 %v257_v0  ;;  %v177_v2 = vld [vmem:[#allocation5] ss:$8 sps:$4 sm:$0xff]   ;;  %83 = vmatprep.subr.bf16.mxu0 %v175_v1  ;;  %v178_v3 = vld [vmem:[#allocation5 + $0x14] ss:$8 sps:$4 sm:$0xff]   ;;  %v180_v4 = vld [vmem:[#allocation5 + $0x10] ss:$8 sps:$4 sm:$0xff]  }
  0x29   :  { %84 = vmatpush1.bf16.msra.mxu0 %v177_v2  ;;  %v42_v5 = vld [vmem:[#allocation2] sm:$0x1]  ;;  %v70_v7 = vshrl.u32 %v69_v6, 7  ;;  %v47_v9 = vld [vmem:[%s328_s2] sm:$0x3]  ;;  %s259_s12 = smov [#allocation7]  }
  0x2a   :  { %85 = vmatprep.subr.bf16.mxu0 %v178_v3  ;;  %v258_v11 = vmov 1966171168   ;;  %s153_s13 = sshll.u32 %s259_s12, 4  ;;  %vm144_vm1 = vcmp.lt.s32.totalorder %v69_v6, 256  ;;  %s154_s13 = int_to_ptr.vmem [resolvable:$true] %s153_s13 }
  0x2b   :  { %v71_v8 = vsub.s32 0, %v70_v7  ;;  %v75_v10 = vsub.s32 1, %v70_v7  ;;  %v128_v12 = vunpack.c.l.s4 %v258_v11  ;;  %s225_s2 = scalar_lea.vmem %s154_s13, 32  ;;  %p230_p3 = scmp.lt.s32.totalorder %s154_s13, %s154_s13 }
  0x2c   :  { %p226_p2 = scmp.ne.s32.totalorder %s154_s13, %s225_s2  ;;  %p231_p4 = scmp.lt.s32.totalorder %s225_s2, %s225_s2 }
  0x2d   :  { %86 = vmatpush1.bf16.msra.mxu0 %v180_v4  ;;  %v72_v13 = vrot.slane %v47_v9, %v71_v8  ;;  %v76_v14 = vrot.slane %v47_v9, %v75_v10  ;;  %v129_v15 = vunpack.c.0.s8 %v128_v12 }
  0x2e   :  { %p232_p5 = por %p231_p4, %p230_p3 }
  0x2f   :  { %v132_v20 = vsub.s32 %v129_v15, %v70_v7 }
  0x30   :  { %167 = vmatmul.mubr.msk.bf16.vlgmr.msra.gmra.mrb[0].mxu0 %vm79_vm0, %v42_v5  ;;  %p233_p6 = pnand %p232_p5, %p226_p2 }
 0x103   :  { %v117_v16 = vpop.f32.mrb[0].mxu0 }
 0x104   :  { %v118_v17 = vadd.f32 %v117_v16, %v72_v13  ;;  %v119_v18 = vpop.f32.mrb[1].mxu0 }
 0x105   :  { %v120_v19 = vadd.f32 %v119_v18, %v76_v14  ;;  %v121_v21 = vpop.f32.mrb[2].mxu0 }
 0x106   :  { %v122_v22 = vpop.f32.mrb[3].mxu0 }
 0x107   :  { %v126_v23 = vcombine.low %v118_v17, %v120_v19 }
 0x109   :  { %v133_v24 = vrot.slane %v126_v23, %v132_v20 }
 0x10b   :  { %v140_v25 = vrot.slane %v133_v24, %v132_v20 }
 0x10d   :  { %146 = vst.msk [vmem:[#allocation7] sm:$0x3] %vm144_vm1, %v140_v25 }
 0x10e   :  { %236 = shalt.err (!%p233_p6)
}
 0x10f   :  { %s237_s16 = scalar_lea.hbm %s329_s3, 32 }
 0x110   :  { %p238_p7 = scmp.ne.s32.totalorder %s329_s3, %s237_s16  ;;  %p241_p8 = scmp.lt.u32.totalorder %s237_s16, %s329_s3 }
 0x112   :  { %p243_p9 = pnand %p241_p8, %p238_p7 }
 0x114   :  { %246 = shalt.err (!%p243_p9)
}
 0x115   :  { %156 = dma.vmem_to_hbm [thread:$0]  %s154_s13, 32, %s329_s3, [#allocation4]  }
 0x116   :  { %251 = dma.done.wait [#allocation4], 32  }
 0x117   :  { %252 = vsyncadd [#allocation4], 4294967264 }
 0x118   :  { %160 = vsyncpa [#allocation3], 1 }
 0x119   :  { %161 = vsyncpa [#allocation6], 1 }
 0x11a   :  { %162 = vsyncpa [#allocation4], 1 }

</bundles_post_ra>
